<compile_context>
chip_gen: v5e
topology: v5e:2x2
jax: 0.10.0
libtpu: 0.0.40
codegen_flags: <defaults>
</compile_context>

<pallas_src>
import functools

import jax
import jax.numpy as jnp
from jax.experimental import pallas as pl
from jax.experimental.pallas import tpu as pltpu


def _round_up(a, b):
    return (a + b - 1) // b * b


def _vmem_budget_bytes():
    """Per-TensorCore VMEM budget, generation aware, with headroom."""
    cap = None
    try:
        info = pltpu.get_tpu_info()
        cap = getattr(info, "vmem_capacity_bytes", None)
    except Exception:
        cap = None
    if not cap:
        cap = 64 * 1024 * 1024  # conservative fallback: v7x per-TC physical VMEM
    # ~20% headroom for compiler internal scratch / semaphores; never above 112 MiB.
    return int(min(cap * 0.8, 112 * 1024 * 1024))


def _pick_inner_chunk(dip, max_chunk=1024):
    """Largest multiple of 128 that divides dip and is <= max_chunk."""
    best = 128
    c = 128
    while c <= min(dip, max_chunk):
        if dip % c == 0:
            best = c
        c += 128
    return best


def _spec(shape, index_map, *, single_buffered=False):
    """BlockSpec; constant-index blocks are single-buffered when supported."""
    if single_buffered and hasattr(pl, "Buffered"):
        try:
            return pl.BlockSpec(shape, index_map, pipeline_mode=pl.Buffered(1))
        except TypeError:
            pass
    return pl.BlockSpec(shape, index_map)


def _make_layer_norm(g_ref, be_ref, d_valid, dmp, eps):
    lane_mask = jax.lax.broadcasted_iota(jnp.int32, (1, dmp), 1) < d_valid
    inv_d = 1.0 / float(d_valid)

    def layer_norm(v):  # v: f32 (tm, dmp); padded lanes of v are exactly zero.
        mean = jnp.sum(v, axis=-1, keepdims=True) * inv_d
        centered = jnp.where(lane_mask, v - mean, 0.0)
        var = jnp.sum(centered * centered, axis=-1, keepdims=True) * inv_d
        inv = jax.lax.rsqrt(var + eps)
        gamma = g_ref[...].astype(jnp.float32)
        beta = be_ref[...].astype(jnp.float32)
        return centered * inv * gamma + beta  # padded lanes stay zero (gamma/beta padded 0)

    return layer_norm


def _ffn_resident_kernel(x_ref, w1_ref, b1_ref, w2_ref, b2_ref, g_ref, be_ref,
                         o_ref, *, pre_lnorm, eps, d_valid, inner_chunk, n_chunks):
    """Weights-resident path: full (padded) W1/W2 live in VMEM; 1-D row grid."""
    tm, dmp = x_ref.shape
    layer_norm = _make_layer_norm(g_ref, be_ref, d_valid, dmp, eps)

    x = x_ref[...]
    xf = x.astype(jnp.float32)
    if pre_lnorm:
        vin = layer_norm(xf).astype(w1_ref.dtype)
    else:
        vin = x if x.dtype == w1_ref.dtype else x.astype(w1_ref.dtype)

    acc = jnp.zeros((tm, dmp), jnp.float32)
    for c in range(n_chunks):  # static chunk loop bounds the (tm, chunk) intermediate
        s = c * inner_chunk
        w1c = w1_ref[:, s:s + inner_chunk]
        w2c = w2_ref[s:s + inner_chunk, :]
        b1c = b1_ref[:, s:s + inner_chunk].astype(jnp.float32)
        h = jnp.dot(vin, w1c, preferred_element_type=jnp.float32)
        h = jnp.maximum(h + b1c, 0.0)              # ReLU; dropout = identity (eval)
        acc = acc + jnp.dot(h.astype(w2c.dtype), w2c,
                            preferred_element_type=jnp.float32)

    core = acc + b2_ref[...].astype(jnp.float32)
    if pre_lnorm:
        result = core + xf
    else:
        result = layer_norm(xf + core)
    o_ref[...] = result.astype(o_ref.dtype)


def _ffn_ktiled_kernel(x_ref, w1_ref, b1_ref, w2_ref, b2_ref, g_ref, be_ref,
                       o_ref, *scratch, pre_lnorm, eps, d_valid):
    """Weight-streaming fallback: d_inner tiled on the second ("arbitrary") grid axis."""
    if pre_lnorm:
        vin_ref, acc_ref = scratch
    else:
        (acc_ref,) = scratch

    k = pl.program_id(1)
    nk = pl.num_programs(1)
    dmp = x_ref.shape[-1]
    layer_norm = _make_layer_norm(g_ref, be_ref, d_valid, dmp, eps)

    @pl.when(k == 0)
    def _init():
        acc_ref[...] = jnp.zeros_like(acc_ref)
        if pre_lnorm:
            vin_ref[...] = layer_norm(
                x_ref[...].astype(jnp.float32)).astype(vin_ref.dtype)

    if pre_lnorm:
        vin = vin_ref[...]
    else:
        x = x_ref[...]
        vin = x if x.dtype == w1_ref.dtype else x.astype(w1_ref.dtype)

    h = jnp.dot(vin, w1_ref[...], preferred_element_type=jnp.float32)
    h = jnp.maximum(h + b1_ref[...].astype(jnp.float32), 0.0)
    acc_ref[...] += jnp.dot(h.astype(w2_ref.dtype), w2_ref[...],
                            preferred_element_type=jnp.float32)

    @pl.when(k == nk - 1)
    def _finalize():
        xf = x_ref[...].astype(jnp.float32)
        core = acc_ref[...] + b2_ref[...].astype(jnp.float32)
        if pre_lnorm:
            result = core + xf
        else:
            result = layer_norm(xf + core)
        o_ref[...] = result.astype(o_ref.dtype)


def _resident_footprint(tm, dmp, dip, ck, isz, w_isz, pre_lnorm):
    f = 0
    f += 2 * tm * dmp * isz            # x blocks (double buffered)
    f += 2 * tm * dmp * isz            # out blocks (double buffered)
    f += 2 * dmp * dip * w_isz         # w1 + w2 (single buffered, constant index)
    f += dip * w_isz + 3 * dmp * 4     # b1, b2, gamma, beta
    f += tm * dmp * 4                  # f32 accumulator value
    f += tm * ck * (4 + w_isz)         # (tm, ck) activation + cast copy
    if pre_lnorm:
        f += tm * dmp * 4              # LN(x) intermediate
    return int(f * 1.15) + (1 << 20)   # headroom for compiler temporaries


def _ktiled_footprint(tm, tk, dmp, isz, w_isz, pre_lnorm):
    f = 0
    f += 2 * tm * dmp * isz            # x blocks
    f += 2 * tm * dmp * isz            # out blocks
    f += 2 * dmp * tk * w_isz          # w1 blocks (double buffered)
    f += 2 * tk * dmp * w_isz          # w2 blocks (double buffered)
    f += 2 * tk * w_isz + 3 * dmp * 4  # b1 blocks + b2/gamma/beta
    f += tm * dmp * 4                  # f32 accumulator scratch
    if pre_lnorm:
        f += tm * dmp * w_isz          # LN(x) scratch
    f += tm * tk * (4 + w_isz)         # (tm, tk) activation + cast copy
    return int(f * 1.15) + (1 << 20)


def positionwise_ff(x, w1, b1, w2, b2, gamma, beta, *,
                    pre_lnorm=False, eps=1e-5,
                    tile_rows=None, tile_inner=None, force_ktiled=False):
    """x: (seq, batch, d_model).  Returns same shape/dtype.  Eval-mode dropout."""
    seq, bsz, d_model = x.shape
    d_inner = w1.shape[1]
    rows = seq * bsz

    isz = jnp.dtype(x.dtype).itemsize
    w_isz = jnp.dtype(w1.dtype).itemsize

    dmp = _round_up(d_model, 128)       # lane-dense d_model
    dip = _round_up(d_inner, 128)
    rows8 = _round_up(rows, 8)
    budget = _vmem_budget_bytes()

    if tile_rows is not None:
        tm_candidates = [max(8, _round_up(int(tile_rows), 8))]
    else:
        # Large row tiles push arithmetic intensity (2*tm/itemsize flops per weight
        # byte) past the HBM/compute crossover; multiples of 256 fill the 256-wide
        # MXU on v6e/v7x.
        tm_candidates = [2048, 1024, 512, 256, 128, 64, 32, 16, 8]

    use_resident = not force_ktiled
    tm = tk = ck = None

    if use_resident:
        ck = _pick_inner_chunk(dip, max_chunk=1024)
        for cand in tm_candidates:
            t = min(cand, rows8)
            if _resident_footprint(t, dmp, dip, ck, isz, w_isz, pre_lnorm) <= budget:
                tm = t
                break
        if tm is None:
            use_resident = False

    if not use_resident:
        if tile_inner is not None:
            tk_candidates = [max(128, _round_up(int(tile_inner), 128))]
        else:
            tk_candidates = [1024, 512, 256, 128]
        for cand in tm_candidates:
            t = min(cand, rows8)
            done = False
            for kc in tk_candidates:
                kk = min(kc, dip)
                if _ktiled_footprint(t, kk, dmp, isz, w_isz, pre_lnorm) <= budget:
                    tm, tk = t, kk
                    done = True
                    break
            if done:
                break
        if tk is None:                  # last resort: smallest tiles
            tm, tk = min(8, rows8), 128

    rows_p = _round_up(rows, tm)
    di_pad = dip if use_resident else _round_up(d_inner, tk)

    # Zero-pad only when needed (zeros are mathematically inert here).
    # TODO(synk): in a real model, pad weights once at parameter-prep time, not per call.
    def pad2d(a, r, c):
        pr, pc = r - a.shape[0], c - a.shape[1]
        return a if (pr == 0 and pc == 0) else jnp.pad(a, ((0, pr), (0, pc)))

    x2d = pad2d(x.reshape(rows, d_model), rows_p, dmp)
    w1p = pad2d(w1, dmp, di_pad)
    w2p = pad2d(w2, di_pad, dmp)
    b1p = pad2d(b1.reshape(1, d_inner), 1, di_pad)
    b2p = pad2d(b2.reshape(1, d_model), 1, dmp)
    gp = pad2d(gamma.reshape(1, d_model), 1, dmp)
    bep = pad2d(beta.reshape(1, d_model), 1, dmp)

    if use_resident:
        kernel = functools.partial(
            _ffn_resident_kernel, pre_lnorm=pre_lnorm, eps=eps, d_valid=d_model,
            inner_chunk=ck, n_chunks=di_pad // ck)
        grid = (rows_p // tm,)
        in_specs = [
            _spec((tm, dmp), lambda i: (i, 0)),                              # x rows
            _spec((dmp, di_pad), lambda i: (0, 0), single_buffered=True),    # w1 (resident)
            _spec((1, di_pad), lambda i: (0, 0), single_buffered=True),      # b1
            _spec((di_pad, dmp), lambda i: (0, 0), single_buffered=True),    # w2 (resident)
            _spec((1, dmp), lambda i: (0, 0), single_buffered=True),         # b2
            _spec((1, dmp), lambda i: (0, 0), single_buffered=True),         # gamma
            _spec((1, dmp), lambda i: (0, 0), single_buffered=True),         # beta
        ]
        out_specs = pl.BlockSpec((tm, dmp), lambda i: (i, 0))
        scratch_shapes = []
        dim_sem = ("parallel",)
    else:
        kernel = functools.partial(
            _ffn_ktiled_kernel, pre_lnorm=pre_lnorm, eps=eps, d_valid=d_model)
        grid = (rows_p // tm, di_pad // tk)
        in_specs = [
            _spec((tm, dmp), lambda i, k: (i, 0)),                           # x rows
            _spec((dmp, tk), lambda i, k: (0, k)),                           # w1 chunk
            _spec((1, tk), lambda i, k: (0, k)),                             # b1 chunk
            _spec((tk, dmp), lambda i, k: (k, 0)),                           # w2 chunk
            _spec((1, dmp), lambda i, k: (0, 0), single_buffered=True),      # b2
            _spec((1, dmp), lambda i, k: (0, 0), single_buffered=True),      # gamma
            _spec((1, dmp), lambda i, k: (0, 0), single_buffered=True),      # beta
        ]
        out_specs = pl.BlockSpec((tm, dmp), lambda i, k: (i, 0))
        scratch_shapes = (
            ([pltpu.VMEM((tm, dmp), w1.dtype)] if pre_lnorm else [])
            + [pltpu.VMEM((tm, dmp), jnp.float32)])
        dim_sem = ("parallel", "arbitrary")

    out2d = pl.pallas_call(
        kernel,
        out_shape=jax.ShapeDtypeStruct((rows_p, dmp), x.dtype),
        grid_spec=pltpu.PrefetchScalarGridSpec(
            num_scalar_prefetch=0,
            grid=grid,
            in_specs=in_specs,
            out_specs=out_specs,
            scratch_shapes=scratch_shapes,
        ),
        compiler_params=pltpu.CompilerParams(
            dimension_semantics=dim_sem,
            vmem_limit_bytes=budget),
    )(x2d, w1p, b1p, w2p, b2p, gp, bep)

    if rows_p != rows or dmp != d_model:
        out2d = out2d[:rows, :d_model]
    return out2d.reshape(seq, bsz, d_model)


def _reference(x, w1, b1, w2, b2, gamma, beta, *, pre_lnorm=False, eps=1e-5):
    def ln(v):
        m = jnp.mean(v, axis=-1, keepdims=True)
        var = jnp.mean((v - m) ** 2, axis=-1, keepdims=True)
        return (v - m) * jax.lax.rsqrt(var + eps) * gamma + beta

    def core(v):
        h = jnp.maximum(v @ w1 + b1, 0.0)
        return h @ w2 + b2

    if pre_lnorm:
        return core(ln(x)) + x
    return ln(x + core(x))


if __name__ == "__main__":
    # Small shapes consistent with the module: seq=8, batch=2, d_model=32, d_inner=256.
    seq, bsz, d_model, d_inner = 8, 2, 32, 256

    key = jax.random.PRNGKey(0)
    kx, k1, k2, k3, k4 = jax.random.split(key, 5)

    x = jax.random.normal(kx, (seq, bsz, d_model), dtype=jnp.float32)

    # Deterministic param init (PyTorch-Linear-like uniform scales).
    lim1 = 1.0 / jnp.sqrt(d_model)
    lim2 = 1.0 / jnp.sqrt(d_inner)
    w1 = jax.random.uniform(k1, (d_model, d_inner), minval=-lim1, maxval=lim1, dtype=jnp.float32)
    b1 = jax.random.uniform(k2, (d_inner,), minval=-lim1, maxval=lim1, dtype=jnp.float32)
    w2 = jax.random.uniform(k3, (d_inner, d_model), minval=-lim2, maxval=lim2, dtype=jnp.float32)
    b2 = jax.random.uniform(k4, (d_model,), minval=-lim2, maxval=lim2, dtype=jnp.float32)
    gamma = jnp.ones((d_model,), dtype=jnp.float32)
    beta = jnp.zeros((d_model,), dtype=jnp.float32)

    ok = True
    for pre_lnorm in (False, True):
        ref = _reference(x, w1, b1, w2, b2, gamma, beta, pre_lnorm=pre_lnorm)

        # Weights-resident fast path (auto selection).
        out_res = jax.block_until_ready(
            positionwise_ff(x, w1, b1, w2, b2, gamma, beta, pre_lnorm=pre_lnorm))
        # K-tiled streaming fallback (forced; multiple row tiles + d_inner chunks).
        out_kt = jax.block_until_ready(
            positionwise_ff(x, w1, b1, w2, b2, gamma, beta, pre_lnorm=pre_lnorm,
                            force_ktiled=True, tile_rows=8, tile_inner=128))

        assert out_res.shape == (seq, bsz, d_model)
        assert out_kt.shape == (seq, bsz, d_model)
        ok &= bool(jnp.allclose(out_res, ref, atol=1e-4, rtol=1e-4))
        ok &= bool(jnp.allclose(out_kt, ref, atol=1e-4, rtol=1e-4))

    assert ok
    print("KERNEL_OK")
</pallas_src>

<mosaic_0001>
module attributes {stable_mosaic.version = 11 : i64} {
  func.func @_ffn_resident_kernel(%arg0: i32, %arg1: memref<16x128xf32, #tpu.memory_space<vmem>>, %arg2: memref<128x256xf32, #tpu.memory_space<vmem>>, %arg3: memref<1x256xf32, #tpu.memory_space<vmem>>, %arg4: memref<256x128xf32, #tpu.memory_space<vmem>>, %arg5: memref<1x128xf32, #tpu.memory_space<vmem>>, %arg6: memref<1x128xf32, #tpu.memory_space<vmem>>, %arg7: memref<1x128xf32, #tpu.memory_space<vmem>>, %arg8: memref<16x128xf32, #tpu.memory_space<vmem>>) attributes {dimension_semantics = [#tpu.dimension_semantics<parallel>], iteration_bounds = array<i64: 1>, scalar_prefetch = 0 : i64, scratch_operands = 0 : i64, tpu.core_type = #tpu.core_type<tc>, window_params = [{transform_indices = @transform_0, window_bounds = array<i64: 16, 128>}, {pipeline_mode = #tpu.pipeline_mode<synchronous>, transform_indices = @transform_1, window_bounds = array<i64: 128, 256>}, {pipeline_mode = #tpu.pipeline_mode<synchronous>, transform_indices = @transform_2, window_bounds = array<i64: 1, 256>}, {pipeline_mode = #tpu.pipeline_mode<synchronous>, transform_indices = @transform_3, window_bounds = array<i64: 256, 128>}, {pipeline_mode = #tpu.pipeline_mode<synchronous>, transform_indices = @transform_4, window_bounds = array<i64: 1, 128>}, {pipeline_mode = #tpu.pipeline_mode<synchronous>, transform_indices = @transform_5, window_bounds = array<i64: 1, 128>}, {pipeline_mode = #tpu.pipeline_mode<synchronous>, transform_indices = @transform_6, window_bounds = array<i64: 1, 128>}, {transform_indices = @transform_7, window_bounds = array<i64: 16, 128>}]} {
    %0 = tpu.iota {dimensions = array<i32: 1>} : vector<1x128xi32>
    %c32_i32 = arith.constant 32 : i32
    %1 = vector.broadcast %c32_i32 : i32 to vector<1x128xi32>
    %2 = arith.cmpi slt, %0, %1 : vector<1x128xi32>
    %c0 = arith.constant 0 : index
    %c0_0 = arith.constant 0 : index
    %3 = vector.load %arg1[%c0, %c0_0] : memref<16x128xf32, #tpu.memory_space<vmem>>, vector<16x128xf32>
    %cst = arith.constant 0.000000e+00 : f32
    %4 = vector.broadcast %cst : f32 to vector<16x128xf32>
    %c0_1 = arith.constant 0 : index
    %c0_2 = arith.constant 0 : index
    %5 = vector.load %arg2[%c0_1, %c0_2] : memref<128x256xf32, #tpu.memory_space<vmem>>, vector<128x256xf32>
    %c0_3 = arith.constant 0 : index
    %c0_4 = arith.constant 0 : index
    %6 = vector.load %arg4[%c0_3, %c0_4] : memref<256x128xf32, #tpu.memory_space<vmem>>, vector<256x128xf32>
    %c0_5 = arith.constant 0 : index
    %c0_6 = arith.constant 0 : index
    %7 = vector.load %arg3[%c0_5, %c0_6] : memref<1x256xf32, #tpu.memory_space<vmem>>, vector<1x256xf32>
    %cst_7 = arith.constant dense<0.000000e+00> : vector<16x256xf32>
    %8 = tpu.matmul %3, %5, %cst_7 {dimension_numbers = #tpu.dot_dimension_numbers<[1], [0], [0], [1], [0, 0, 1, 1], [], []>} : vector<16x128xf32>, vector<128x256xf32>, vector<16x256xf32> -> vector<16x256xf32>
    %9 = vector.broadcast %7 : vector<1x256xf32> to vector<16x256xf32>
    %10 = arith.addf %8, %9 : vector<16x256xf32>
    %cst_8 = arith.constant 0.000000e+00 : f32
    %11 = vector.broadcast %cst_8 : f32 to vector<16x256xf32>
    %12 = arith.maximumf %10, %11 : vector<16x256xf32>
    %cst_9 = arith.constant dense<0.000000e+00> : vector<16x128xf32>
    %13 = tpu.matmul %12, %6, %cst_9 {dimension_numbers = #tpu.dot_dimension_numbers<[1], [0], [0], [1], [0, 0, 1, 1], [], []>} : vector<16x256xf32>, vector<256x128xf32>, vector<16x128xf32> -> vector<16x128xf32>
    %14 = arith.addf %4, %13 : vector<16x128xf32>
    %c0_10 = arith.constant 0 : index
    %c0_11 = arith.constant 0 : index
    %15 = vector.load %arg5[%c0_10, %c0_11] : memref<1x128xf32, #tpu.memory_space<vmem>>, vector<1x128xf32>
    %16 = vector.broadcast %15 : vector<1x128xf32> to vector<16x128xf32>
    %17 = arith.addf %14, %16 : vector<16x128xf32>
    %18 = arith.addf %3, %17 : vector<16x128xf32>
    %cst_12 = arith.constant dense<0.000000e+00> : vector<16xf32>
    %19 = vector.multi_reduction <add>, %18, %cst_12 [1] : vector<16x128xf32> to vector<16xf32>
    %20 = vector.shape_cast %19 : vector<16xf32> to vector<16x1xf32>
    %cst_13 = arith.constant 3.125000e-02 : f32
    %21 = vector.broadcast %cst_13 : f32 to vector<16x1xf32>
    %22 = arith.mulf %20, %21 : vector<16x1xf32>
    %23 = vector.broadcast %22 : vector<16x1xf32> to vector<16x128xf32>
    %24 = arith.subf %18, %23 : vector<16x128xf32>
    %cst_14 = arith.constant 0.000000e+00 : f32
    %25 = vector.shape_cast %2 : vector<1x128xi1> to vector<1x128xi1>
    %26 = vector.broadcast %25 : vector<1x128xi1> to vector<16x128xi1>
    %27 = vector.broadcast %cst_14 : f32 to vector<16x128xf32>
    %28 = arith.select %26, %24, %27 : vector<16x128xi1>, vector<16x128xf32>
    %29 = arith.mulf %28, %28 : vector<16x128xf32>
    %cst_15 = arith.constant dense<0.000000e+00> : vector<16xf32>
    %30 = vector.multi_reduction <add>, %29, %cst_15 [1] : vector<16x128xf32> to vector<16xf32>
    %31 = vector.shape_cast %30 : vector<16xf32> to vector<16x1xf32>
    %cst_16 = arith.constant 3.125000e-02 : f32
    %32 = vector.broadcast %cst_16 : f32 to vector<16x1xf32>
    %33 = arith.mulf %31, %32 : vector<16x1xf32>
    %cst_17 = arith.constant 9.99999974E-6 : f32
    %34 = vector.broadcast %cst_17 : f32 to vector<16x1xf32>
    %35 = arith.addf %33, %34 : vector<16x1xf32>
    %36 = math.rsqrt %35 : vector<16x1xf32>
    %c0_18 = arith.constant 0 : index
    %c0_19 = arith.constant 0 : index
    %37 = vector.load %arg6[%c0_18, %c0_19] : memref<1x128xf32, #tpu.memory_space<vmem>>, vector<1x128xf32>
    %c0_20 = arith.constant 0 : index
    %c0_21 = arith.constant 0 : index
    %38 = vector.load %arg7[%c0_20, %c0_21] : memref<1x128xf32, #tpu.memory_space<vmem>>, vector<1x128xf32>
    %39 = vector.broadcast %36 : vector<16x1xf32> to vector<16x128xf32>
    %40 = arith.mulf %28, %39 : vector<16x128xf32>
    %41 = vector.broadcast %37 : vector<1x128xf32> to vector<16x128xf32>
    %42 = arith.mulf %40, %41 : vector<16x128xf32>
    %43 = vector.broadcast %38 : vector<1x128xf32> to vector<16x128xf32>
    %44 = arith.addf %42, %43 : vector<16x128xf32>
    %c0_22 = arith.constant 0 : index
    %c0_23 = arith.constant 0 : index
    %45 = vector.load %arg8[%c0_22, %c0_23] : memref<16x128xf32, #tpu.memory_space<vmem>>, vector<16x128xf32>
    tpu.vector_store %arg8[%c0_22, %c0_23], %44 {strides = array<i32>} : memref<16x128xf32, #tpu.memory_space<vmem>>, vector<16x128xf32>,
    return
  }
  func.func @transform_0(%arg0: i32) -> (i32, i32) {
    %c0_i32 = arith.constant 0 : i32
    %c0_i32_0 = arith.constant 0 : i32
    return %arg0, %c0_i32 : i32, i32
  }
  func.func @transform_1(%arg0: i32) -> (i32, i32) {
    %c0_i32 = arith.constant 0 : i32
    %c0_i32_0 = arith.constant 0 : i32
    %c0_i32_1 = arith.constant 0 : i32
    return %c0_i32, %c0_i32_0 : i32, i32
  }
  func.func @transform_2(%arg0: i32) -> (i32, i32) {
    %c0_i32 = arith.constant 0 : i32
    %c0_i32_0 = arith.constant 0 : i32
    %c0_i32_1 = arith.constant 0 : i32
    return %c0_i32, %c0_i32_0 : i32, i32
  }
  func.func @transform_3(%arg0: i32) -> (i32, i32) {
    %c0_i32 = arith.constant 0 : i32
    %c0_i32_0 = arith.constant 0 : i32
    %c0_i32_1 = arith.constant 0 : i32
    return %c0_i32, %c0_i32_0 : i32, i32
  }
  func.func @transform_4(%arg0: i32) -> (i32, i32) {
    %c0_i32 = arith.constant 0 : i32
    %c0_i32_0 = arith.constant 0 : i32
    %c0_i32_1 = arith.constant 0 : i32
    return %c0_i32, %c0_i32_0 : i32, i32
  }
  func.func @transform_5(%arg0: i32) -> (i32, i32) {
    %c0_i32 = arith.constant 0 : i32
    %c0_i32_0 = arith.constant 0 : i32
    %c0_i32_1 = arith.constant 0 : i32
    return %c0_i32, %c0_i32_0 : i32, i32
  }
  func.func @transform_6(%arg0: i32) -> (i32, i32) {
    %c0_i32 = arith.constant 0 : i32
    %c0_i32_0 = arith.constant 0 : i32
    %c0_i32_1 = arith.constant 0 : i32
    return %c0_i32, %c0_i32_0 : i32, i32
  }
  func.func @transform_7(%arg0: i32) -> (i32, i32) {
    %c0_i32 = arith.constant 0 : i32
    %c0_i32_0 = arith.constant 0 : i32
    return %arg0, %c0_i32 : i32, i32
  }
}

</mosaic_0001>

<bundles_post_ra>
// kernel: tpu_custom_call.1
= control target key start
LH: loop header
LB: loop body
LE: loop exit
PB: predicated region body
PF: predicated region fallthrough
CT: control target
= control target key end

     0   :  { %12 = vsyncpa [#allocation3], 0  ;;  %s570_s0 = inlined_call_operand.hbm [shape: f32[16,128], index: 0, kind: input, shape index: {}]   ;;  %s571_s1 = inlined_call_operand.hbm [shape: f32[128,256], index: 1, kind: input, shape index: {}]   ;;  %s572_s2 = inlined_call_operand.hbm [shape: f32[1,256], index: 2, kind: input, shape index: {}]   ;;  %s573_s3 = inlined_call_operand.hbm [shape: f32[256,128], index: 3, kind: input, shape index: {}]   ;;  %s574_s4 = inlined_call_operand.vmem [shape: f32[1,128], index: 4, kind: input, shape index: {}]   ;;  %s575_s5 = inlined_call_operand.vmem [shape: f32[1,128], index: 5, kind: input, shape index: {}]   ;;  %s576_s6 = inlined_call_operand.vmem [shape: f32[1,128], index: 6, kind: input, shape index: {}]   ;;  %s577_s7 = inlined_call_operand.hbm [shape: f32[16,128], index: 7, kind: output, shape index: {}]  }
   0x1   :  { %13 = vsyncpa [#allocation6], 0 }
   0x2   :  { %14 = vsyncpa [#allocation9], 0  ;;  %s33_s26 = sshll.u32 %s571_s1, 4  ;;  %s34_s26 = int_to_ptr.hbm [resolvable:$true] %s33_s26 }
   0x3   :  { %15 = vsyncpa [#allocation4], 0  ;;  %s488_s27 = smov [#allocation5]   ;;  %s20_s8 = sshll.u32 %s570_s0, 4  ;;  %s21_s8 = int_to_ptr.hbm [resolvable:$true] %s20_s8 }
   0x4   :  { %s35_s28 = sshll.u32 %s488_s27, 4  ;;  %s489_s9 = smov 256   ;;  %s36_s28 = int_to_ptr.vmem [resolvable:$true] %s35_s28 }
   0x5   :  { %s490_s10 = smov 16   ;;  %s491_s11 = smov [#allocation2]  }
   0x6   :  { %41 = dma.hbm_to_vmem [thread:$0]  %s34_s26, 4096, %s36_s28, [#allocation6], %s489_s9, %s489_s9, %s490_s10  }
   0x7   :  { %s22_s12 = sshll.u32 %s491_s11, 4  ;;  %s492_s13 = smov 128   ;;  %s23_s12 = int_to_ptr.vmem [resolvable:$true] %s22_s12 }
   0x8   :  { %s493_s14 = smov 8   ;;  %s47_s16 = sshll.u32 %s572_s2, 4  ;;  %s48_s16 = int_to_ptr.hbm [resolvable:$true] %s47_s16 }
   0x9   :  { %28 = dma.hbm_to_vmem [thread:$0]  %s21_s8, 256, %s23_s12, [#allocation3], %s492_s13, %s492_s13, %s493_s14  }
   0xa   :  { %s494_s17 = smov [#allocation7]   ;;  %s57_s20 = sshll.u32 %s573_s3, 4  ;;  %s58_s20 = int_to_ptr.hbm [resolvable:$true] %s57_s20 }
   0xb   :  { %s49_s0 = sshll.u32 %s494_s17, 4  ;;  %s495_s21 = smov [#allocation8]   ;;  %s50_s0 = int_to_ptr.vmem [resolvable:$true] %s49_s0 }
   0xc   :  { %52 = dma.hbm_to_vmem [thread:$0]  %s48_s16, 32, %s50_s0, [#allocation6]  }
   0xd   :  { %s59_s22 = sshll.u32 %s495_s21, 4  ;;  %s60_s22 = int_to_ptr.vmem [resolvable:$true] %s59_s22 }
   0xe   :  { %65 = dma.hbm_to_vmem [thread:$0]  %s58_s20, 4096, %s60_s22, [#allocation9], %s492_s13, %s492_s13, %s493_s14  }
   0xf   :  { %480 = dma.done.wait [#allocation3], 256  }
  0x10   :  { %481 = vsyncadd [#allocation3], 4294967040 }
  0x11   :  { %482 = dma.done.wait [#allocation6], 4128  }
  0x12   :  { %483 = vsyncadd [#allocation6], 4294963168 }
  0x13   :  { %484 = dma.done.wait [#allocation9], 4096  }
  0x14   :  { %485 = vsyncadd [#allocation9], 4294963200  ;;  %v123_v0 = vld [vmem:[#allocation5 + $0xf0] sm:$0xff]  ;;  %v121_v1 = vld [vmem:[#allocation5 + $0xe0] sm:$0xff]  ;;  %s496_s26 = smov [#allocation10]   ;;  %s329_s29 = sshll.u32 %s577_s7, 4  ;;  %s330_s29 = int_to_ptr.hbm [resolvable:$true] %s329_s29 }
  0x15   :  { %v124_v2 = vld [vmem:[#allocation5 + $0xf8] sm:$0xff]  ;;  %163 = vmatpush.msra.mxu0 %v123_v0  ;;  %v122_v3 = vld [vmem:[#allocation5 + $0xe8] sm:$0xff]  ;;  %v119_v4 = vld [vmem:[#allocation5 + $0xd0] sm:$0xff] }
  0x16   :  { %186 = vmatpush.msra.mxu1 %v124_v2  ;;  %v120_v5 = vld [vmem:[#allocation5 + $0xd8] sm:$0xff]  ;;  %v117_v6 = vld [vmem:[#allocation5 + $0xc0] sm:$0xff]  ;;  %v118_v7 = vld [vmem:[#allocation5 + $0xc8] sm:$0xff] }
  0x17   :  { %164 = vmatpush.msra.mxu0 %v121_v1  ;;  %v115_v8 = vld [vmem:[#allocation5 + $0xb0] sm:$0xff]  ;;  %v116_v9 = vld [vmem:[#allocation5 + $0xb8] sm:$0xff]  ;;  %v113_v10 = vld [vmem:[#allocation5 + $0xa0] sm:$0xff] }
  0x18   :  { %187 = vmatpush.msra.mxu1 %v122_v3  ;;  %v114_v11 = vld [vmem:[#allocation5 + $0xa8] sm:$0xff]  ;;  %v111_v12 = vld [vmem:[#allocation5 + $0x90] sm:$0xff]  ;;  %v112_v13 = vld [vmem:[#allocation5 + $0x98] sm:$0xff] }
  0x19   :  { %165 = vmatpush.msra.mxu0 %v119_v4  ;;  %v140_v14 = vld [vmem:[#allocation8 + $0x78] sm:$0xff]  ;;  %v139_v15 = vld [vmem:[#allocation8 + $0x70] sm:$0xff]  ;;  %v110_v17 = vld [vmem:[#allocation5 + $0x88] sm:$0xff] }
  0x1a   :  { %188 = vmatpush.msra.mxu1 %v120_v5  ;;  %v109_v16 = vld [vmem:[#allocation5 + $0x80] sm:$0xff]  ;;  %217 = vmatpush.msra.mxu2 %v140_v14  ;;  %v138_v19 = vld [vmem:[#allocation8 + $0x68] sm:$0xff]  ;;  %v155_v20 = vld [vmem:[#allocation8 + $0xf0] sm:$0xff] }
  0x1b   :  { %166 = vmatpush.msra.mxu0 %v117_v6  ;;  %v156_v18 = vld [vmem:[#allocation8 + $0xf8] sm:$0xff]  ;;  %v107_v21 = vld [vmem:[#allocation5 + $0x70] sm:$0xff]  ;;  %v137_v23 = vld [vmem:[#allocation8 + $0x60] sm:$0xff] }
  0x1c   :  { %189 = vmatpush.msra.mxu1 %v118_v7  ;;  %v108_v22 = vld [vmem:[#allocation5 + $0x78] sm:$0xff]  ;;  %218 = vmatpush.msra.mxu2 %v139_v15  ;;  %v154_v24 = vld [vmem:[#allocation8 + $0xe8] sm:$0xff]  ;;  %v105_v25 = vld [vmem:[#allocation5 + $0x60] sm:$0xff] }
  0x1d   :  { %167 = vmatpush.msra.mxu0 %v115_v8  ;;  %240 = vmatpush.msra.mxu3 %v156_v18  ;;  %v106_v26 = vld [vmem:[#allocation5 + $0x68] sm:$0xff]  ;;  %v136_v27 = vld [vmem:[#allocation8 + $0x58] sm:$0xff]  ;;  %v103_v29 = vld [vmem:[#allocation5 + $0x50] sm:$0xff] }
  0x1e   :  { %190 = vmatpush.msra.mxu1 %v116_v9  ;;  %219 = vmatpush.msra.mxu2 %v138_v19  ;;  %v153_v28 = vld [vmem:[#allocation8 + $0xe0] sm:$0xff]  ;;  %v104_v30 = vld [vmem:[#allocation5 + $0x58] sm:$0xff]  ;;  %v134_v35 = vld [vmem:[#allocation8 + $0x48] sm:$0xff] }
  0x1f   :  { %168 = vmatpush.msra.mxu0 %v113_v10  ;;  %241 = vmatpush.msra.mxu3 %v155_v20  ;;  %v101_v31 = vld [vmem:[#allocation5 + $0x40] sm:$0xff]  ;;  %v135_v32 = vld [vmem:[#allocation8 + $0x50] sm:$0xff]  ;;  %v102_v34 = vld [vmem:[#allocation5 + $0x48] sm:$0xff] }
  0x20   :  { %191 = vmatpush.msra.mxu1 %v114_v11  ;;  %220 = vmatpush.msra.mxu2 %v137_v23  ;;  %v152_v33 = vld [vmem:[#allocation8 + $0xd8] sm:$0xff]  ;;  %v151_v36 = vld [vmem:[#allocation8 + $0xd0] sm:$0xff]  ;;  %v133_v39 = vld [vmem:[#allocation8 + $0x40] sm:$0xff] }
  0x21   :  { %169 = vmatpush.msra.mxu0 %v111_v12  ;;  %242 = vmatpush.msra.mxu3 %v154_v24  ;;  %v99_v37 = vld [vmem:[#allocation5 + $0x30] sm:$0xff]  ;;  %v100_v38 = vld [vmem:[#allocation5 + $0x38] sm:$0xff]  ;;  %v97_v41 = vld [vmem:[#allocation5 + $0x20] sm:$0xff] }
  0x22   :  { %192 = vmatpush.msra.mxu1 %v112_v13  ;;  %221 = vmatpush.msra.mxu2 %v136_v27  ;;  %v150_v40 = vld [vmem:[#allocation8 + $0xc8] sm:$0xff]  ;;  %v132_v43 = vld [vmem:[#allocation8 + $0x38] sm:$0xff]  ;;  %v149_v44 = vld [vmem:[#allocation8 + $0xc0] sm:$0xff] }
  0x23   :  { %170 = vmatpush.msra.mxu0 %v109_v16  ;;  %243 = vmatpush.msra.mxu3 %v153_v28  ;;  %v98_v42 = vld [vmem:[#allocation5 + $0x28] sm:$0xff]  ;;  %v95_v45 = vld [vmem:[#allocation5 + $0x10] sm:$0xff]  ;;  %v96_v46 = vld [vmem:[#allocation5 + $0x18] sm:$0xff]  ;;  %v88_v28 = vlaneseq }
  0x24   :  { %193 = vmatpush.msra.mxu1 %v110_v17  ;;  %222 = vmatpush.msra.mxu2 %v135_v32  ;;  %v131_v47 = vld [vmem:[#allocation8 + $0x30] sm:$0xff]  ;;  %v148_v48 = vld [vmem:[#allocation8 + $0xb8] sm:$0xff]  ;;  %v94_v50 = vld [vmem:[#allocation5 + $0x8] sm:$0xff] }
  0x25   :  { %171 = vmatpush.msra.mxu0 %v107_v21  ;;  %244 = vmatpush.msra.mxu3 %v152_v33  ;;  %v93_v49 = vld [vmem:[#allocation5] sm:$0xff]  ;;  %v91_v51 = vld [vmem:[#allocation2] sm:$0xff]  ;;  %v92_v58 = vld [vmem:[#allocation2 + $0x8] sm:$0xff] }
  0x26   :  { %194 = vmatpush.msra.mxu1 %v108_v22  ;;  %223 = vmatpush.msra.mxu2 %v134_v35  ;;  %v130_v52 = vld [vmem:[#allocation8 + $0x28] sm:$0xff]  ;;  %v147_v53 = vld [vmem:[#allocation8 + $0xb0] sm:$0xff]  ;;  %v129_v54 = vld [vmem:[#allocation8 + $0x20] sm:$0xff] }
  0x27   :  { %172 = vmatpush.msra.mxu0 %v105_v25  ;;  %245 = vmatpush.msra.mxu3 %v151_v36  ;;  %v146_v55 = vld [vmem:[#allocation8 + $0xa8] sm:$0xff]  ;;  %v128_v56 = vld [vmem:[#allocation8 + $0x18] sm:$0xff]  ;;  %v145_v57 = vld [vmem:[#allocation8 + $0xa0] sm:$0xff] }
  0x28   :  { %195 = vmatpush.msra.mxu1 %v106_v26  ;;  %224 = vmatpush.msra.mxu2 %v133_v39  ;;  %v127_v59 = vld [vmem:[#allocation8 + $0x10] sm:$0xff]  ;;  %v144_v60 = vld [vmem:[#allocation8 + $0x98] sm:$0xff]  ;;  %v126_v61 = vld [vmem:[#allocation8 + $0x8] sm:$0xff] }
  0x29   :  { %173 = vmatpush.msra.mxu0 %v103_v29  ;;  %246 = vmatpush.msra.mxu3 %v150_v40  ;;  %v143_v62 = vld [vmem:[#allocation8 + $0x90] sm:$0xff]  ;;  %v125_v63 = vld [vmem:[#allocation8] sm:$0xff]  ;;  %v142_v0 = vld [vmem:[#allocation8 + $0x88] sm:$0xff]  ;;  %v89_v29 = vand.u32 127, %v88_v28 }
  0x2a   :  { %196 = vmatpush.msra.mxu1 %v104_v30  ;;  %225 = vmatpush.msra.mxu2 %v132_v43  ;;  %v141_v1 = vld [vmem:[#allocation8 + $0x80] sm:$0xff]  ;;  %v157_v2 = vld [vmem:[#allocation7] sm:$0x3]  ;;  %v353_v17 = vld [vmem:[%s574_s4] ss:$0 sm:$0xff] }
  0x2b   :  { %174 = vmatpush.msra.mxu0 %v101_v31  ;;  %247 = vmatpush.msra.mxu3 %v149_v44  ;;  %v159_v3 = vperm.slane %v157_v2, 0  ;;  %v160_v4 = vperm.slane %v157_v2, 1  ;;  %vm90_vm0 = vcmp.lt.s32.totalorder %v89_v29, 32 }
  0x2c   :  { %197 = vmatpush.msra.mxu1 %v102_v34  ;;  %226 = vmatpush.msra.mxu2 %v131_v47 }
  0x2d   :  { %175 = vmatpush.msra.mxu0 %v99_v37  ;;  %248 = vmatpush.msra.mxu3 %v148_v48 }
  0x2e   :  { %198 = vmatpush.msra.mxu1 %v100_v38  ;;  %227 = vmatpush.msra.mxu2 %v130_v52 }
  0x2f   :  { %176 = vmatpush.msra.mxu0 %v97_v41  ;;  %249 = vmatpush.msra.mxu3 %v147_v53 }
  0x30   :  { %199 = vmatpush.msra.mxu1 %v98_v42  ;;  %228 = vmatpush.msra.mxu2 %v129_v54  ;;  %v354_v54 = vld [vmem:[%s575_s5] ss:$0 sm:$0xff]  ;;  %s327_s5 = sshll.u32 %s496_s26, 4  ;;  %s328_s5 = int_to_ptr.vmem [resolvable:$true] %s327_s5 }
  0x31   :  { %177 = vmatpush.msra.mxu0 %v95_v45  ;;  %250 = vmatpush.msra.mxu3 %v146_v55 }
  0x32   :  { %200 = vmatpush.msra.mxu1 %v96_v46  ;;  %229 = vmatpush.msra.mxu2 %v128_v56 }
  0x33   :  { %178 = vmatpush.msra.mxu0 %v93_v49  ;;  %251 = vmatpush.msra.mxu3 %v145_v57 }
  0x34   :  { %201 = vmatpush.msra.mxu1 %v94_v50  ;;  %179 = vmatmul.f32.vlgmr.msra.gmra.mxu0 %v91_v51 }
  0x35   :  { %202 = vmatmul.f32.vlgmr.msra.gmra.mxu1 %v91_v51  ;;  %230 = vmatpush.msra.mxu2 %v127_v59 }
  0x36   :  { %252 = vmatpush.msra.mxu3 %v144_v60 }
  0x37   :  { %231 = vmatpush.msra.mxu2 %v126_v61 }
  0x38   :  { %253 = vmatpush.msra.mxu3 %v143_v62 }
  0x39   :  { %232 = vmatpush.msra.mxu2 %v125_v63 }
  0x3a   :  { %254 = vmatpush.msra.mxu3 %v142_v0 }
  0x3c   :  { %182 = vmatmul.f32.gmra.mxu0 %v92_v58  ;;  %255 = vmatpush.msra.mxu3 %v141_v1 }
  0x3d   :  { %205 = vmatmul.f32.gmra.mxu1 %v92_v58 }
  0xb1   :  { %v180_v5 = vpop.f32.mrf.mxu0 }
  0xb2   :  { %v203_v6 = vpop.f32.mrf.mxu1  ;;  %v181_v7 = vadd.f32 %v180_v5, %v159_v3 }
  0xb3   :  { %v204_v8 = vadd.f32 %v203_v6, %v160_v4 }
  0xb4   :  { %v209_v9 = vmax.f32 %v181_v7, 0.0 }
  0xb5   :  { %v210_v10 = vmax.f32 %v204_v8, 0.0 }
  0xb6   :  { %233 = vmatmul.f32.vlgmr.msra.gmra.mxu2 %v209_v9 }
  0xb7   :  { %256 = vmatmul.f32.vlgmr.msra.gmra.mxu3 %v210_v10 }
  0xb9   :  { %v183_v11 = vpop.f32.mrf.mxu0 }
  0xba   :  { %v206_v12 = vpop.f32.mrf.mxu1  ;;  %v184_v13 = vadd.f32 %v183_v11, %v159_v3 }
  0xbb   :  { %v207_v14 = vadd.f32 %v206_v12, %v160_v4 }
  0xbc   :  { %v211_v15 = vmax.f32 %v184_v13, 0.0 }
  0xbd   :  { %v212_v16 = vmax.f32 %v207_v14, 0.0 }
  0xbe   :  { %236 = vmatmul.f32.gmra.mxu2 %v211_v15 }
  0xbf   :  { %259 = vmatmul.f32.gmra.mxu3 %v212_v16 }
 0x139   :  { %v234_v18 = vpop.f32.mrf.mxu2 }
 0x13a   :  { %v257_v19 = vpop.f32.mrf.mxu3  ;;  %v235_v20 = vadd.f32 %v353_v17, %v234_v18 }
 0x13c   :  { %v258_v21 = vadd.f32 %v257_v19, %v235_v20 }
 0x13e   :  { %v263_v22 = vadd.f32 %v258_v21, %v91_v51 }
 0x140   :  { %265 = vadd.xlane.f32.xlu0 %v263_v22 }
 0x141   :  { %v237_v23 = vpop.f32.mrf.mxu2 }
 0x142   :  { %v260_v24 = vpop.f32.mrf.mxu3  ;;  %v238_v25 = vadd.f32 %v353_v17, %v237_v23 }
 0x144   :  { %v261_v26 = vadd.f32 %v260_v24, %v238_v25 }
 0x146   :  { %v264_v27 = vadd.f32 %v261_v26, %v92_v58  ;;  %v355_v58 = vld [vmem:[%s576_s6] ss:$0 sm:$0xff] }
 0x148   :  { %267 = vadd.xlane.f32.xlu0 %v264_v27 }
 0x1b3   :  { %v266_v30 = vpop.xlane.xlu0 %265 }
 0x1b4   :  { %v269_v31 = vmul.f32 0.03125, %v266_v30 }
 0x1b6   :  { %v271_v32 = vsub.f32 %v263_v22, %v269_v31 }
 0x1b8   :  { %v275_v33 = vsel %vm90_vm0, %v271_v32, 0.0 }
 0x1b9   :  { %v277_v34 = vmul.f32 %v275_v33, %v275_v33 }
 0x1bb   :  { %279 = vadd.xlane.f32.xlu1 %v277_v34  ;;  %v268_v35 = vpop.xlane.xlu0 %267 }
 0x1bc   :  { %v270_v36 = vmul.f32 0.03125, %v268_v35 }
 0x1be   :  { %v272_v37 = vsub.f32 %v264_v27, %v270_v36 }
 0x1c0   :  { %v276_v38 = vsel %vm90_vm0, %v272_v37, 0.0 }
 0x1c1   :  { %v278_v39 = vmul.f32 %v276_v38, %v276_v38 }
 0x1c3   :  { %281 = vadd.xlane.f32.xlu1 %v278_v39 }
 0x22e   :  { %v280_v40 = vpop.xlane.xlu1 %279 }
 0x22f   :  { %v283_v41 = vmul.f32 0.03125, %v280_v40 }
 0x231   :  { %v285_v42 = vadd.f32 1e-05, %v283_v41 }
 0x233   :  { %356 = vrsqrt.f32 %v285_v42  ;;  %vm293_vm2 = vweird.f32 %v285_v42 }
 0x236   :  { %v282_v43 = vpop.xlane.xlu1 %281 }
 0x237   :  { %v284_v44 = vmul.f32 0.03125, %v282_v43 }
 0x239   :  { %v357_v45 = vpop.eup %356  ;;  %v286_v46 = vadd.f32 1e-05, %v284_v44 }
 0x23a   :  { %v288_v47 = vmul.f32 %v357_v45, %v285_v42  ;;  %vm294_vm1 = vweird.f32 %v357_v45 }
 0x23b   :  { %358 = vrsqrt.f32 %v286_v46  ;;  %vm295_vm3 = vmor %vm293_vm2, %vm294_vm1  ;;  %vm303_vm5 = vweird.f32 %v286_v46 }
 0x23c   :  { %v289_v48 = vmul.f32 %v357_v45, %v288_v47 }
 0x23e   :  { %v290_v49 = vmul.f32 0.5, %v289_v48 }
 0x240   :  { %v291_v50 = vsub.f32 1.5, %v290_v49 }
 0x241   :  { %v359_v51 = vpop.eup %358 }
 0x242   :  { %v292_v52 = vmul.f32 %v357_v45, %v291_v50  ;;  %v298_v53 = vmul.f32 %v359_v51, %v286_v46  ;;  %vm304_vm4 = vweird.f32 %v359_v51 }
 0x243   :  { %vm305_vm6 = vmor %vm303_vm5, %vm304_vm4 }
 0x244   :  { %v296_v55 = vsel %vm295_vm3, %v357_v45, %v292_v52  ;;  %v299_v56 = vmul.f32 %v359_v51, %v298_v53 }
 0x245   :  { %v309_v57 = vmul.f32 %v296_v55, %v275_v33 }
 0x246   :  { %v300_v59 = vmul.f32 0.5, %v299_v56 }
 0x247   :  { %v314_v60 = vmul.f32 %v354_v54, %v309_v57 }
 0x248   :  { %v301_v61 = vsub.f32 1.5, %v300_v59 }
 0x249   :  { %v319_v62 = vadd.f32 %v355_v58, %v314_v60 }
 0x24a   :  { %v302_v63 = vmul.f32 %v359_v51, %v301_v61 }
 0x24b   :  { %321 = vst [vmem:[#allocation10] sm:$0xff] %v319_v62 }
 0x24c   :  { %v306_v0 = vsel %vm305_vm6, %v359_v51, %v302_v63 }
 0x24d   :  { %v310_v1 = vmul.f32 %v306_v0, %v276_v38 }
 0x24f   :  { %v315_v2 = vmul.f32 %v354_v54, %v310_v1 }
 0x251   :  { %v320_v3 = vadd.f32 %v355_v58, %v315_v2 }
 0x253   :  { %322 = vst [vmem:[#allocation10 + $0x8] sm:$0xff] %v320_v3 }
 0x254   :  { %335 = dma.vmem_to_hbm [thread:$0]  %s328_s5, 256, %s330_s29, [#allocation4], %s492_s13, %s492_s13, %s493_s14  }
 0x255   :  { %486 = dma.done.wait [#allocation4], 256  }
 0x256   :  { %487 = vsyncadd [#allocation4], 4294967040 }
 0x257   :  { %340 = vsyncpa [#allocation3], 1 }
 0x258   :  { %341 = vsyncpa [#allocation6], 1 }
 0x259   :  { %342 = vsyncpa [#allocation9], 1 }
 0x25a   :  { %343 = vsyncpa [#allocation4], 1 }

</bundles_post_ra>
